<compile_context>
chip_gen: v5e
topology: v5e:2x2
jax: 0.10.0
libtpu: 0.0.40
codegen_flags: <defaults>
</compile_context>

<pallas_src>
import math

import jax
import jax.numpy as jnp
from jax.experimental import pallas as pl
from jax.experimental.pallas import tpu as pltpu


def _layer_scale_kernel(x_ref, g_ref, o_ref):
    # x_ref: (TILE_R, L) tile in VMEM; g_ref: (1, L) lane-packed gamma (fp32).
    x = x_ref[...].astype(jnp.float32)
    o_ref[...] = (x * g_ref[...]).astype(o_ref.dtype)


def layer_scale(x: jax.Array, gamma: jax.Array) -> jax.Array:
    """Elementwise x * gamma with gamma broadcast over leading axes.

    x: (..., D); gamma: (D,). Returns the same shape/dtype as x.
    """
    orig_shape = x.shape
    D = orig_shape[-1]
    assert gamma.shape == (D,), f"gamma shape {gamma.shape} != ({D},)"
    total = x.size
    itemsize = jnp.dtype(x.dtype).itemsize

    LANE = 128
    L = math.lcm(D, LANE)
    if total % L == 0:
        # Lane-pack: grow lane width toward 1024 while it still tiles the
        # flattened array exactly (lane-dense output = unmasked vst).
        while L < 1024 and total % (2 * L) == 0:
            L *= 2
        rows = total // L
        x2d = x.reshape(rows, L)
        g2d = jnp.tile(gamma.astype(jnp.float32), L // D).reshape(1, L)
    else:
        # Fallback: lane-sparse (rows, D) layout (correct, less efficient).
        rows = total // D
        L = D
        x2d = x.reshape(rows, D)
        g2d = gamma.astype(jnp.float32).reshape(1, D)

    # Row tile sized for ~2 MiB per buffer.  With default double-buffering of
    # input and output (~4 buffers) this stays well under the scoped VMEM
    # limit on every generation while keeping per-grid-step overhead
    # negligible relative to the DMA time of a 2 MiB tile.
    target_bytes = 2 * 1024 * 1024
    tile_r = max(8, (target_bytes // (L * itemsize)) // 8 * 8)
    if tile_r >= rows:
        tile_r = rows  # full extent is always a legal block shape
    grid_r = pl.cdiv(rows, tile_r)

    out2d = pl.pallas_call(
        _layer_scale_kernel,
        out_shape=jax.ShapeDtypeStruct((rows, L), x.dtype),
        grid_spec=pltpu.PrefetchScalarGridSpec(
            num_scalar_prefetch=0,
            grid=(grid_r,),
            in_specs=[
                pl.BlockSpec((tile_r, L), lambda i: (i, 0)),
                # gamma: tiny, constant-index VMEM block (one DMA total,
                # revisited from VMEM every step).
                pl.BlockSpec((1, L), lambda i: (0, 0)),
            ],
            out_specs=pl.BlockSpec((tile_r, L), lambda i: (i, 0)),
        ),
        compiler_params=pltpu.CompilerParams(
            # Parallel row-tile axis: lets v7x shard the streaming loop
            # across both TensorCores; harmless on v5e/v6e.
            dimension_semantics=("parallel",),
        ),
    )(x2d, g2d)

    return out2d.reshape(orig_shape)


if __name__ == "__main__":
    # Module parameters: dim=32, init_values=1e-5 -> gamma = 1e-5 * ones(dim)
    dim = 32
    init_values = 1e-5
    gamma = init_values * jnp.ones((dim,), dtype=jnp.float32)

    # Deterministic example input: (batch=2, seq=8, dim=32)
    key = jax.random.PRNGKey(0)
    x = jax.random.normal(key, (2, 8, dim), dtype=jnp.float32)

    out = layer_scale(x, gamma)
    out = jax.block_until_ready(out)

    # Sanity check against plain-JAX reference (same as PyTorch x * gamma).
    ref = x * gamma
    assert out.shape == x.shape and out.dtype == x.dtype
    assert jnp.allclose(out, ref, atol=1e-6, rtol=1e-6)

    print("KERNEL_OK")
</pallas_src>

<mosaic_0001>
module attributes {stable_mosaic.version = 11 : i64} {
  func.func @_layer_scale_kernel(%arg0: i32, %arg1: memref<1x512xf32, #tpu.memory_space<vmem>>, %arg2: memref<1x512xf32, #tpu.memory_space<vmem>>, %arg3: memref<1x512xf32, #tpu.memory_space<vmem>>) attributes {dimension_semantics = [#tpu.dimension_semantics<parallel>], iteration_bounds = array<i64: 1>, scalar_prefetch = 0 : i64, scratch_operands = 0 : i64, tpu.core_type = #tpu.core_type<tc>, window_params = [{transform_indices = @transform_0, window_bounds = array<i64: 1, 512>}, {pipeline_mode = #tpu.pipeline_mode<synchronous>, transform_indices = @transform_1, window_bounds = array<i64: 1, 512>}, {transform_indices = @transform_2, window_bounds = array<i64: 1, 512>}]} {
    %c0 = arith.constant 0 : index
    %c0_0 = arith.constant 0 : index
    %0 = vector.load %arg1[%c0, %c0_0] : memref<1x512xf32, #tpu.memory_space<vmem>>, vector<1x512xf32>
    %c0_1 = arith.constant 0 : index
    %c0_2 = arith.constant 0 : index
    %1 = vector.load %arg2[%c0_1, %c0_2] : memref<1x512xf32, #tpu.memory_space<vmem>>, vector<1x512xf32>
    %2 = arith.mulf %0, %1 : vector<1x512xf32>
    %c0_3 = arith.constant 0 : index
    %c0_4 = arith.constant 0 : index
    %3 = vector.load %arg3[%c0_3, %c0_4] : memref<1x512xf32, #tpu.memory_space<vmem>>, vector<1x512xf32>
    tpu.vector_store %arg3[%c0_3, %c0_4], %2 {strides = array<i32>} : memref<1x512xf32, #tpu.memory_space<vmem>>, vector<1x512xf32>,
    return
  }
  func.func @transform_0(%arg0: i32) -> (i32, i32) {
    %c0_i32 = arith.constant 0 : i32
    %c0_i32_0 = arith.constant 0 : i32
    return %arg0, %c0_i32 : i32, i32
  }
  func.func @transform_1(%arg0: i32) -> (i32, i32) {
    %c0_i32 = arith.constant 0 : i32
    %c0_i32_0 = arith.constant 0 : i32
    %c0_i32_1 = arith.constant 0 : i32
    return %c0_i32, %c0_i32_0 : i32, i32
  }
  func.func @transform_2(%arg0: i32) -> (i32, i32) {
    %c0_i32 = arith.constant 0 : i32
    %c0_i32_0 = arith.constant 0 : i32
    return %arg0, %c0_i32 : i32, i32
  }
}

</mosaic_0001>

<bundles_post_ra>
// kernel: tpu_custom_call.1
= control target key start
LH: loop header
LB: loop body
LE: loop exit
PB: predicated region body
PF: predicated region fallthrough
CT: control target
= control target key end

     0   :  { %7 = vsyncpa [#allocation3], 0  ;;  %s174_s0 = inlined_call_operand.hbm [shape: f32[1,512], index: 0, kind: input, shape index: {}]   ;;  %s175_s1 = inlined_call_operand.hbm [shape: f32[1,512], index: 1, kind: input, shape index: {}]   ;;  %s176_s2 = inlined_call_operand.hbm [shape: f32[1,512], index: 2, kind: output, shape index: {}]  }
   0x1   :  { %8 = vsyncpa [#allocation6], 0 }
   0x2   :  { %9 = vsyncpa [#allocation4], 0  ;;  %s15_s11 = sshll.u32 %s174_s0, 4  ;;  %s147_s12 = smov [#allocation2]   ;;  %s16_s11 = int_to_ptr.hbm [resolvable:$true] %s15_s11 }
   0x3   :  { %s17_s13 = sshll.u32 %s147_s12, 4  ;;  %s26_s16 = sshll.u32 %s175_s1, 4  ;;  %s18_s13 = int_to_ptr.vmem [resolvable:$true] %s17_s13  ;;  %s27_s16 = int_to_ptr.hbm [resolvable:$true] %s26_s16 }
   0x4   :  { %20 = dma.hbm_to_vmem [thread:$0]  %s16_s11, 64, %s18_s13, [#allocation3]  }
   0x5   :  { %s148_s17 = smov [#allocation5]  }
   0x6   :  { %s28_s18 = sshll.u32 %s148_s17, 4  ;;  %s29_s18 = int_to_ptr.vmem [resolvable:$true] %s28_s18 }
   0x7   :  { %31 = dma.hbm_to_vmem [thread:$0]  %s27_s16, 64, %s29_s18, [#allocation6]  }
   0x8   :  { %141 = dma.done.wait [#allocation3], 64  }
   0x9   :  { %142 = vsyncadd [#allocation3], 4294967232 }
   0xa   :  { %143 = dma.done.wait [#allocation6], 64  }
   0xb   :  { %144 = vsyncadd [#allocation6], 4294967232  ;;  %v43_v0 = vlaneseq  ;;  %s149_s0 = smov [#allocation7]   ;;  %s55_s22 = sshll.u32 %s176_s2, 4  ;;  %v40_v1 = vld [vmem:[#allocation2] sm:$0xf]  ;;  %s56_s22 = int_to_ptr.hbm [resolvable:$true] %s55_s22 }
   0xc   :  { %s53_s19 = sshll.u32 %s149_s0, 4  ;;  %v41_v2 = vld [vmem:[#allocation5] sm:$0xf]  ;;  %s54_s19 = int_to_ptr.vmem [resolvable:$true] %s53_s19 }
   0xd   :  { %vm45_vm0 = vcmp.lt.s32.totalorder %v43_v0, 512  ;;  %v42_v3 = vmul.f32 %v41_v2, %v40_v1 }
   0xf   :  { %47 = vst.msk [vmem:[#allocation7] sm:$0xf] %vm45_vm0, %v42_v3 }
  0x10   :  { %58 = dma.vmem_to_hbm [thread:$0]  %s54_s19, 64, %s56_s22, [#allocation4]  }
  0x11   :  { %145 = dma.done.wait [#allocation4], 64  }
  0x12   :  { %146 = vsyncadd [#allocation4], 4294967232 }
  0x13   :  { %63 = vsyncpa [#allocation3], 1 }
  0x14   :  { %64 = vsyncpa [#allocation6], 1 }
  0x15   :  { %65 = vsyncpa [#allocation4], 1 }

</bundles_post_ra>
